<compile_context>
chip_gen: v7x
topology: tpu7x:2x2x1
jax: 0.10.0
libtpu: 0.0.40
codegen_flags: <defaults>
</compile_context>

<pallas_src>
import functools

import jax
import jax.numpy as jnp
from jax import lax
from jax.experimental import pallas as pl
from jax.experimental.pallas import tpu as pltpu

_LANE = 128
_SUB = 8
_MAX_BLOCK_ROWS = 4096   # 4096*128*4B = 2 MiB f32 per input block


def _num_shards():
    """2 TensorCores per chip only on v7x; v5e/v6e are single-TC."""
    try:
        kind = jax.devices()[0].device_kind.lower()
    except Exception:
        return 1
    if "v7" in kind or "tpu7" in kind:
        # TODO(synk): verify via xprof that the "parallel" shard axis really
        # lands on both TensorCores; switch to pltpu.CORE_PARALLEL if not.
        return 2
    return 1


def _dist_kernel(a_ref, b_ref, o_ref, acc_ref, *,
                 bpc, block_rows, valid_rows, n_blocks, needs_mask):
    c = pl.program_id(0)   # shard (split across TensorCores on multi-TC chips)
    j = pl.program_id(1)   # sequential reduction sweep within the shard

    # zero this shard's accumulator at the start of its sweep
    @pl.when(j == 0)
    def _():
        acc_ref[...] = jnp.zeros_like(acc_ref)

    d = a_ref[...].astype(jnp.float32) - b_ref[...].astype(jnp.float32)
    sq = d * d

    def _accum(vals):
        # (block_rows,128) -> (block_rows//8, 8, 128): the leading axis indexes
        # whole (8,128) vregs, so the axis-0 sum is pure per-vreg VPU adds
        # (no XLU), and only one vld/vst for the tiny accumulator per step.
        acc_ref[...] += vals.reshape(-1, _SUB, _LANE).sum(axis=0)

    if needs_mask:
        blk = c * bpc + j

        @pl.when(blk < n_blocks - 1)
        def _():   # interior blocks: unmasked fast path (vast majority)
            _accum(sq)

        @pl.when(blk >= n_blocks - 1)
        def _():   # partial last block + clamped over-coverage blocks
            row_idx = blk * block_rows + lax.broadcasted_iota(
                jnp.int32, sq.shape, 0)
            _accum(jnp.where(row_idx < valid_rows, sq, 0.0))
    else:
        _accum(sq)

    # write the tiny per-shard partial sums once, at the end of the sweep
    @pl.when(j == bpc - 1)
    def _():
        o_ref[0] = acc_ref[...]


def pallas_dist(a, b):
    """Equivalent of torch.dist(a, b) (p=2). Returns a float32 scalar."""
    a = jnp.asarray(a)
    b = jnp.asarray(b)
    shape = jnp.broadcast_shapes(a.shape, b.shape)
    # TODO(synk): for genuinely-broadcast operands this materializes the
    # expanded array in HBM; an in-kernel broadcast would avoid the traffic.
    # It is a no-op for the common same-shape case.
    if a.shape != shape:
        a = jnp.broadcast_to(a, shape)
    if b.shape != shape:
        b = jnp.broadcast_to(b, shape)

    a_f = a.reshape(-1)
    b_f = b.reshape(-1)
    n = a_f.shape[0]
    if n == 0:
        return jnp.float32(0.0)

    # tile granularity matched to the narrower input's native sublane packing
    itemsize = min(jnp.dtype(a.dtype).itemsize, jnp.dtype(b.dtype).itemsize)
    sub_rows = _SUB * max(1, 4 // itemsize)
    tile = sub_rows * _LANE

    n_main = (n // tile) * tile
    total = jnp.float32(0.0)

    if n_main > 0:
        rows = n_main // _LANE                      # multiple of sub_rows
        a2 = a_f[:n_main].reshape(rows, _LANE)
        b2 = b_f[:n_main].reshape(rows, _LANE)

        block_rows = min(_MAX_BLOCK_ROWS, rows)     # multiple of sub_rows
        n_blocks = pl.cdiv(rows, block_rows)
        n_shards = min(_num_shards(), n_blocks)
        bpc = pl.cdiv(n_blocks, n_shards)           # blocks per shard
        over_covers = n_shards * bpc > n_blocks
        needs_mask = over_covers or (rows % block_rows != 0)

        if over_covers:
            def in_map(c, j):
                # over-covering shards re-read the last valid block; their
                # contribution is fully masked inside the kernel
                return (jnp.minimum(c * bpc + j, n_blocks - 1), 0)
        else:
            def in_map(c, j):
                return (c * bpc + j, 0)

        kernel = functools.partial(
            _dist_kernel, bpc=bpc, block_rows=block_rows,
            valid_rows=rows, n_blocks=n_blocks, needs_mask=needs_mask)

        bytes_in = n_main * (jnp.dtype(a.dtype).itemsize
                             + jnp.dtype(b.dtype).itemsize)
        partials = pl.pallas_call(
            kernel,
            out_shape=jax.ShapeDtypeStruct((n_shards, _SUB, _LANE), jnp.float32),
            grid_spec=pltpu.PrefetchScalarGridSpec(
                num_scalar_prefetch=0,
                grid=(n_shards, bpc),
                in_specs=[
                    pl.BlockSpec((block_rows, _LANE), in_map),
                    pl.BlockSpec((block_rows, _LANE), in_map),
                ],
                out_specs=pl.BlockSpec((1, _SUB, _LANE), lambda c, j: (c, 0, 0)),
                scratch_shapes=[pltpu.VMEM((_SUB, _LANE), jnp.float32)],
            ),
            compiler_params=pltpu.CompilerParams(
                dimension_semantics=("parallel", "arbitrary"),
            ),
            cost_estimate=pl.CostEstimate(
                flops=3 * n_main,
                transcendentals=0,
                bytes_accessed=bytes_in + n_shards * _SUB * _LANE * 4),
        )(a2, b2)
        total = total + jnp.sum(partials)

    if n_main < n:
        # ragged tail (< one tile): fold in with a tiny plain-JAX sum instead
        # of padding/copying both full operands in HBM.
        td = a_f[n_main:].astype(jnp.float32) - b_f[n_main:].astype(jnp.float32)
        total = total + jnp.sum(td * td)

    return jnp.sqrt(total)


if __name__ == "__main__":
    key = jax.random.PRNGKey(0)
    k0, k1 = jax.random.split(key)
    # module forward takes a pair of same-shaped tensors
    x0 = jax.random.normal(k0, (2, 4, 16, 16), dtype=jnp.float32)
    x1 = jax.random.normal(k1, (2, 4, 16, 16), dtype=jnp.float32)

    result = pallas_dist(x0, x1)
    result = jax.block_until_ready(result)

    # reference check (plain JAX)
    ref = jnp.sqrt(jnp.sum((x0 - x1) ** 2))
    assert jnp.allclose(result, ref, rtol=1e-5, atol=1e-5), (result, ref)

    print("KERNEL_OK")
</pallas_src>

<mosaic_0001>
module attributes {stable_mosaic.version = 11 : i64} {
  func.func @_dist_kernel(%arg0: i32, %arg1: i32, %arg2: memref<16x128xf32, #tpu.memory_space<vmem>>, %arg3: memref<16x128xf32, #tpu.memory_space<vmem>>, %arg4: memref<1x8x128xf32, #tpu.memory_space<vmem>>, %arg5: memref<8x128xf32, #tpu.memory_space<vmem>>) attributes {dimension_semantics = [#tpu.dimension_semantics<parallel>, #tpu.dimension_semantics<arbitrary>], iteration_bounds = array<i64: 1, 1>, scalar_prefetch = 0 : i64, scratch_operands = 1 : i64, tpu.core_type = #tpu.core_type<tc>, window_params = [{transform_indices = @transform_0, window_bounds = array<i64: 16, 128>}, {transform_indices = @transform_1, window_bounds = array<i64: 16, 128>}, {transform_indices = @transform_2, window_bounds = array<i64: 1, 8, 128>}]} {
    %c0_i32 = arith.constant 0 : i32
    %0 = arith.cmpi eq, %arg1, %c0_i32 : i32
    %1 = arith.extui %0 : i1 to i32
    %c0_i32_0 = arith.constant 0 : i32
    %2 = arith.cmpi ne, %1, %c0_i32_0 : i32
    scf.if %2 {
      %cst_10 = arith.constant 0.000000e+00 : f32
      %15 = vector.broadcast %cst_10 : f32 to vector<8x128xf32>
      %c0_11 = arith.constant 0 : index
      %c0_12 = arith.constant 0 : index
      %16 = vector.load %arg5[%c0_11, %c0_12] : memref<8x128xf32, #tpu.memory_space<vmem>>, vector<8x128xf32>
      tpu.vector_store %arg5[%c0_11, %c0_12], %15 {strides = array<i32>} : memref<8x128xf32, #tpu.memory_space<vmem>>, vector<8x128xf32>,
    } else {
    }
    %c0 = arith.constant 0 : index
    %c0_1 = arith.constant 0 : index
    %3 = vector.load %arg2[%c0, %c0_1] : memref<16x128xf32, #tpu.memory_space<vmem>>, vector<16x128xf32>
    %c0_2 = arith.constant 0 : index
    %c0_3 = arith.constant 0 : index
    %4 = vector.load %arg3[%c0_2, %c0_3] : memref<16x128xf32, #tpu.memory_space<vmem>>, vector<16x128xf32>
    %5 = arith.subf %3, %4 : vector<16x128xf32>
    %6 = arith.mulf %5, %5 : vector<16x128xf32>
    %c0_4 = arith.constant 0 : index
    %c0_5 = arith.constant 0 : index
    %7 = vector.load %arg5[%c0_4, %c0_5] : memref<8x128xf32, #tpu.memory_space<vmem>>, vector<8x128xf32>
    %8 = vector.shape_cast %6 : vector<16x128xf32> to vector<2x8x128xf32>
    %cst = arith.constant dense<0.000000e+00> : vector<8x128xf32>
    %9 = vector.multi_reduction <add>, %8, %cst [0] : vector<2x8x128xf32> to vector<8x128xf32>
    %10 = arith.addf %7, %9 : vector<8x128xf32>
    %c0_6 = arith.constant 0 : index
    %c0_7 = arith.constant 0 : index
    %11 = vector.load %arg5[%c0_6, %c0_7] : memref<8x128xf32, #tpu.memory_space<vmem>>, vector<8x128xf32>
    tpu.vector_store %arg5[%c0_6, %c0_7], %10 {strides = array<i32>} : memref<8x128xf32, #tpu.memory_space<vmem>>, vector<8x128xf32>,
    %c0_i32_8 = arith.constant 0 : i32
    %12 = arith.cmpi eq, %arg1, %c0_i32_8 : i32
    %13 = arith.extui %12 : i1 to i32
    %c0_i32_9 = arith.constant 0 : i32
    %14 = arith.cmpi ne, %13, %c0_i32_9 : i32
    scf.if %14 {
      %c0_10 = arith.constant 0 : index
      %c0_11 = arith.constant 0 : index
      %15 = vector.load %arg5[%c0_10, %c0_11] : memref<8x128xf32, #tpu.memory_space<vmem>>, vector<8x128xf32>
      %c0_12 = arith.constant 0 : index
      %c0_13 = arith.constant 0 : index
      %c0_14 = arith.constant 0 : index
      %16 = vector.load %arg4[%c0_12, %c0_13, %c0_14] : memref<1x8x128xf32, #tpu.memory_space<vmem>>, vector<1x8x128xf32>
      %17 = vector.shape_cast %16 : vector<1x8x128xf32> to vector<8x128xf32>
      %18 = vector.shape_cast %15 : vector<8x128xf32> to vector<1x8x128xf32>
      tpu.vector_store %arg4[%c0_12, %c0_13, %c0_14], %18 {strides = array<i32>} : memref<1x8x128xf32, #tpu.memory_space<vmem>>, vector<1x8x128xf32>,
    } else {
    }
    return
  }
  func.func @transform_0(%arg0: i32, %arg1: i32) -> (i32, i32) {
    %c1_i32 = arith.constant 1 : i32
    %0 = arith.muli %arg0, %c1_i32 : i32
    %1 = arith.addi %0, %arg1 : i32
    %c0_i32 = arith.constant 0 : i32
    %c0_i32_0 = arith.constant 0 : i32
    return %1, %c0_i32 : i32, i32
  }
  func.func @transform_1(%arg0: i32, %arg1: i32) -> (i32, i32) {
    %c1_i32 = arith.constant 1 : i32
    %0 = arith.muli %arg0, %c1_i32 : i32
    %1 = arith.addi %0, %arg1 : i32
    %c0_i32 = arith.constant 0 : i32
    %c0_i32_0 = arith.constant 0 : i32
    return %1, %c0_i32 : i32, i32
  }
  func.func @transform_2(%arg0: i32, %arg1: i32) -> (i32, i32, i32) {
    %c0_i32 = arith.constant 0 : i32
    %c0_i32_0 = arith.constant 0 : i32
    %c0_i32_1 = arith.constant 0 : i32
    return %arg0, %c0_i32, %c0_i32_0 : i32, i32, i32
  }
}

</mosaic_0001>

<bundles_post_ra>
// kernel: tpu_custom_call.1
= control target key start
LH: loop header
LB: loop body
LE: loop exit
PB: predicated region body
PF: predicated region fallthrough
CT: control target
= control target key end

     0   :  { %7 = vsyncpa [#allocation4], 0  ;;  %s223_s0 = inlined_call_operand.hbm [shape: f32[16,128], index: 0, kind: input, shape index: {}]   ;;  %s224_s1 = inlined_call_operand.hbm [shape: f32[16,128], index: 1, kind: input, shape index: {}]   ;;  %s225_s2 = inlined_call_operand.hbm [shape: f32[1,8,128], index: 2, kind: output, shape index: {}]  }
   0x1   :  { %8 = vsyncpa [#allocation7], 0 }
   0x2   :  { %9 = vsyncpa [#allocation5], 0  ;;  %s167_s9 = smov [#allocation3]   ;;  %s95_s13 = scalar_lea.hbm %s223_s0, 256 }
   0x3   :  { %s19_s10 = sshll.u32 %s167_s9, 4  ;;  %p96_p0 = scmp.ne.s32.totalorder %s223_s0, %s95_s13  ;;  %s20_s10 = int_to_ptr.vmem [resolvable:$true] %s19_s10 }
   0x4   :  { %p99_p1 = scmp.lt.u32.totalorder %s95_s13, %s223_s0 }
   0x6   :  { %p101_p2 = pnand %p99_p1, %p96_p0 }
   0x8   :  { %104 = shalt.err (!%p101_p2)
}
   0x9   :  { %s105_s18 = scalar_lea.vmem %s20_s10, 256  ;;  %p110_p4 = scmp.lt.s32.totalorder %s20_s10, %s20_s10 }
   0xa   :  { %p106_p3 = scmp.ne.s32.totalorder %s20_s10, %s105_s18  ;;  %p111_p5 = scmp.lt.s32.totalorder %s105_s18, %s105_s18 }
   0xc   :  { %p112_p6 = por %p111_p5, %p110_p4 }
   0xe   :  { %p113_p7 = pnand %p112_p6, %p106_p3 }
  0x10   :  { %116 = shalt.err (!%p113_p7)
}
  0x11   :  { %s168_s19 = smov 128   ;;  %s169_s20 = smov 8  }
  0x12   :  { %25 = dma.hbm_to_vmem [thread:$0]  %s223_s0, 256, %s20_s10, [#allocation4], %s168_s19, %s168_s19, %s169_s20  }
  0x13   :  { %s170_s23 = smov [#allocation6]   ;;  %s117_s27 = scalar_lea.hbm %s224_s1, 256 }
  0x14   :  { %s35_s24 = sshll.u32 %s170_s23, 4  ;;  %p118_p8 = scmp.ne.s32.totalorder %s224_s1, %s117_s27  ;;  %s36_s24 = int_to_ptr.vmem [resolvable:$true] %s35_s24 }
  0x15   :  { %p121_p9 = scmp.lt.u32.totalorder %s117_s27, %s224_s1 }
  0x17   :  { %p123_p10 = pnand %p121_p9, %p118_p8 }
  0x19   :  { %126 = shalt.err (!%p123_p10)
}
  0x1a   :  { %s127_s4 = scalar_lea.vmem %s36_s24, 256  ;;  %p132_p12 = scmp.lt.s32.totalorder %s36_s24, %s36_s24 }
  0x1b   :  { %p128_p11 = scmp.ne.s32.totalorder %s36_s24, %s127_s4  ;;  %p133_p13 = scmp.lt.s32.totalorder %s127_s4, %s127_s4 }
  0x1d   :  { %p134_p0 = por %p133_p13, %p132_p12 }
  0x1f   :  { %p135_p1 = pnand %p134_p0, %p128_p11 }
  0x21   :  { %138 = shalt.err (!%p135_p1)
}
  0x22   :  { %41 = dma.hbm_to_vmem [thread:$0]  %s224_s1, 256, %s36_s24, [#allocation7], %s168_s19, %s168_s19, %s169_s20  }
  0x23   :  { %161 = dma.done.wait [#allocation4], 256  }
  0x24   :  { %162 = vsyncadd [#allocation4], 4294967040 }
  0x25   :  { %163 = dma.done.wait [#allocation7], 256  }
  0x26   :  { %164 = vsyncadd [#allocation7], 4294967040  ;;  %v57_v0 = vld [vmem:[#allocation3] sm:$0xff]  ;;  %v58_v1 = vld [vmem:[#allocation3 + $0x8] sm:$0xff]  ;;  %s171_s6 = smov [#allocation8]  }
  0x27   :  { %v59_v2 = vld [vmem:[#allocation6] sm:$0xff]  ;;  %v60_v3 = vld [vmem:[#allocation6 + $0x8] sm:$0xff]  ;;  %s80_s7 = sshll.u32 %s171_s6, 4  ;;  %s81_s7 = int_to_ptr.vmem [resolvable:$true] %s80_s7 }
  0x28   :  { %v61_v4 = vsub.f32 %v57_v0, %v59_v2  ;;  %v62_v5 = vsub.f32 %v58_v1, %v60_v3  ;;  %s139_s8 = scalar_lea.vmem %s81_s7, 128  ;;  %p144_p3 = scmp.lt.s32.totalorder %s81_s7, %s81_s7 }
  0x29   :  { %p140_p2 = scmp.ne.s32.totalorder %s81_s7, %s139_s8  ;;  %p145_p4 = scmp.lt.s32.totalorder %s139_s8, %s139_s8 }
  0x2a   :  { %v63_v6 = vmul.f32 %v61_v4, %v61_v4  ;;  %v64_v7 = vmul.f32 %v62_v5, %v62_v5 }
  0x2b   :  { %p146_p5 = por %p145_p4, %p144_p3 }
  0x2c   :  { %v66_v8 = vadd.f32 %v64_v7, %v63_v6 }
  0x2d   :  { %p147_p6 = pnand %p146_p5, %p140_p2 }
  0x2e   :  { %73 = vst [vmem:[#allocation8] sm:$0xff] %v66_v8 }
  0x2f   :  { %150 = shalt.err (!%p147_p6)
}
  0x30   :  { %s151_s10 = scalar_lea.hbm %s225_s2, 128 }
  0x31   :  { %p152_p7 = scmp.ne.s32.totalorder %s225_s2, %s151_s10  ;;  %p155_p8 = scmp.lt.u32.totalorder %s151_s10, %s225_s2 }
  0x33   :  { %p157_p9 = pnand %p155_p8, %p152_p7 }
  0x35   :  { %160 = shalt.err (!%p157_p9)
}
  0x36   :  { %83 = dma.vmem_to_hbm [thread:$0]  %s81_s7, 128, %s225_s2, [#allocation5]  }
  0x37   :  { %165 = dma.done.wait [#allocation5], 128  }
  0x38   :  { %166 = vsyncadd [#allocation5], 4294967168 }
  0x39   :  { %87 = vsyncpa [#allocation4], 1 }
  0x3a   :  { %88 = vsyncpa [#allocation7], 1 }
  0x3b   :  { %89 = vsyncpa [#allocation5], 1 }

</bundles_post_ra>
